<compile_context>
chip_gen: v5e
topology: v5e:2x2
jax: 0.10.0
libtpu: 0.0.40
codegen_flags: <defaults>
</compile_context>

<pallas_src>
import jax
import jax.numpy as jnp
from jax.experimental import pallas as pl
from jax.experimental.pallas import tpu as pltpu


# ----------------------------------------------------------------------------
# Kernel: folded ensemble = 6 small channel matmuls, spatial axis on lanes,
# each final tensor stored directly (lane-dense) from the kernel.
# ----------------------------------------------------------------------------
def _folded_ensemble_kernel(x_ref, w_ref, b_ref, *o_refs):
    # x_ref: (1, Cin, tm)   w_ref: (6, 3, Cin)   b_ref: (6, 3, 1)
    # o_refs: 6 refs, each (1, 3, tm)  -- tm is the lane axis => dense stores.
    x = x_ref[0]                                           # (Cin, tm)
    for i, o_ref in enumerate(o_refs):
        acc = jnp.dot(w_ref[i], x, preferred_element_type=jnp.float32)
        o_ref[0] = (acc + b_ref[i]).astype(o_ref.dtype)


def folded_ensemble_conv(x_ncdhw, w_eff, b_eff, *,
                         vmem_budget_bytes=12 * 1024 * 1024,
                         hard_max_tm=65536):
    """out_i[n, :, p] = w_eff[i] @ x[n, :, p] + b_eff[i] for all spatial p.

    x_ncdhw: (N, Cin, D, H, W); w_eff: (6, 3, Cin); b_eff: (6, 3)
    returns list of 6 arrays, each (N, 3, D, H, W)
    """
    n, cin, d, h, w = x_ncdhw.shape
    m_sp = d * h * w
    num_out, out_ch, _ = w_eff.shape
    ctot = num_out * out_ch

    # Pure reshape: NCDHW -> (N, Cin, D*H*W). No transpose / data movement.
    x_flat = x_ncdhw.reshape(n, cin, m_sp)
    out_dtype = x_flat.dtype

    # Spatial (lane) tile from a VMEM budget: double-buffered IO footprint is
    # ~2*(cin + ctot)*itemsize bytes per lane.
    itemsize = max(jnp.dtype(out_dtype).itemsize, 2)
    per_lane = 2 * (cin + ctot) * itemsize
    max_tm = (vmem_budget_bytes // per_lane) // 128 * 128
    max_tm = int(min(max(max_tm, 512), hard_max_tm))

    # Full extent if it fits (satisfies the (8,128) rule), else a 128-multiple;
    # ragged last tile is handled by the cdiv grid (masked partial writes).
    tm = m_sp if m_sp <= max_tm else max_tm

    # v7x megacore balancing: avoid a single-step grid (one core would idle).
    if n == 1 and m_sp <= tm and m_sp > 256:
        half = -(-m_sp // 2)
        tm = min(tm, -(-half // 128) * 128)

    grid = (n, pl.cdiv(m_sp, tm))

    out_shapes = tuple(jax.ShapeDtypeStruct((n, out_ch, m_sp), out_dtype)
                       for _ in range(num_out))
    out_specs = [pl.BlockSpec((1, out_ch, tm), lambda b, m: (b, 0, m))
                 for _ in range(num_out)]

    outs = pl.pallas_call(
        _folded_ensemble_kernel,
        out_shape=out_shapes,
        grid_spec=pltpu.PrefetchScalarGridSpec(
            num_scalar_prefetch=0,
            grid=grid,
            in_specs=[
                pl.BlockSpec((1, cin, tm), lambda b, m: (b, 0, m)),
                pl.BlockSpec((num_out, out_ch, cin), lambda b, m: (0, 0, 0)),
                pl.BlockSpec((num_out, out_ch, 1), lambda b, m: (0, 0, 0)),
            ],
            out_specs=out_specs,
        ),
        compiler_params=pltpu.CompilerParams(
            dimension_semantics=("parallel", "parallel"),
            vmem_limit_bytes=32 * 1024 * 1024),
    )(x_flat, w_eff, b_eff.reshape(num_out, out_ch, 1))

    return [o.reshape(n, out_ch, d, h, w) for o in outs]


# ----------------------------------------------------------------------------
# EnsembleModel
# ----------------------------------------------------------------------------
class EnsembleModel:
    NUM_OUTPUTS = 6
    SUB_CH = 48     # each submodel emits 48 channels -> cat gives 96
    OUT_CH = 3      # conv0: Conv3d(96, 3, kernel_size=1)

    def __init__(self, c_in, key, compute_dtype=None):
        keys = jax.random.split(key, 4)
        # Synthetic submodels: 6 pointwise convs (c_in -> 48) each.
        self.wA = 0.1 * jax.random.normal(
            keys[0], (self.NUM_OUTPUTS, self.SUB_CH, c_in), jnp.float32)
        self.bA = 0.05 * jax.random.normal(
            keys[1], (self.NUM_OUTPUTS, self.SUB_CH), jnp.float32)
        self.wB = 0.1 * jax.random.normal(
            keys[2], (self.NUM_OUTPUTS, self.SUB_CH, c_in), jnp.float32)
        self.bB = 0.05 * jax.random.normal(
            keys[3], (self.NUM_OUTPUTS, self.SUB_CH), jnp.float32)
        # conv0 weights: PyTorch shape (3, 96, 1, 1, 1) -> stored as (3, 96).
        k0, k1 = jax.random.split(jax.random.fold_in(key, 7))
        bound = 1.0 / jnp.sqrt(96.0)
        self.w0 = jax.random.uniform(
            k0, (self.OUT_CH, self.SUB_CH * 2), jnp.float32, -bound, bound)
        self.b0 = jax.random.uniform(
            k1, (self.OUT_CH,), jnp.float32, -bound, bound)

        self.compute_dtype = compute_dtype
        # Fold once at construction time (not per forward call).
        self.w_eff, self.b_eff = self._fold_weights()

    def _fold_weights(self):
        """Fold submodels + cat + conv0 into W_eff (6,3,Cin), b_eff (6,3).

        out_i = W0a @ (wA_i @ x + bA_i) + W0b @ (wB_i @ x + bB_i) + b0
              = (W0a @ wA_i + W0b @ wB_i) @ x + (W0a @ bA_i + W0b @ bB_i + b0)
        Valid only because the placeholder submodels are purely linear.
        """
        w0a = self.w0[:, : self.SUB_CH]   # (3, 48) -- applies to x1 (cat order)
        w0b = self.w0[:, self.SUB_CH:]    # (3, 48) -- applies to x2
        w_eff = (jnp.einsum("oc,ick->iok", w0a, self.wA)
                 + jnp.einsum("oc,ick->iok", w0b, self.wB))        # (6, 3, Cin)
        b_eff = (jnp.einsum("oc,ic->io", w0a, self.bA)
                 + jnp.einsum("oc,ic->io", w0b, self.bB)
                 + self.b0[None, :])                               # (6, 3)
        return w_eff, b_eff

    def __call__(self, x):
        if self.compute_dtype is not None:
            x = x.astype(self.compute_dtype)
            w = self.w_eff.astype(self.compute_dtype)
        else:
            w = self.w_eff.astype(x.dtype)
        # Kernel emits the 6 final (N, 3, D, H, W) tensors directly.
        return folded_ensemble_conv(x, w, self.b_eff)


# ----------------------------------------------------------------------------
# Reference (pure JAX, mirrors the original sequential PyTorch structure)
# ----------------------------------------------------------------------------
def _ref_pointwise(x, w, b):
    # x: NCDHW, w: (Cout, Cin), b: (Cout,)
    return jnp.einsum("ncdhw,oc->nodhw", x, w) + b[None, :, None, None, None]


def _ref_forward(model, x):
    x1 = [_ref_pointwise(x, model.wA[i], model.bA[i]) for i in range(6)]
    x2 = [_ref_pointwise(x, model.wB[i], model.bB[i]) for i in range(6)]
    outs = []
    for i in range(6):
        cat = jnp.concatenate([x1[i], x2[i]], axis=1)
        outs.append(_ref_pointwise(cat, model.w0, model.b0))
    return outs


if __name__ == "__main__":
    key = jax.random.PRNGKey(0)
    k_x, k_m = jax.random.split(key)

    # x: (N, C, D, H, W) = (2, 4, 4, 8, 8)  ->  spatial M = 4*8*8 = 256 lanes
    x = jax.random.normal(k_x, (2, 4, 4, 8, 8), jnp.float32)

    model = EnsembleModel(c_in=x.shape[1], key=k_m)

    outs = model(x)
    outs = jax.block_until_ready(outs)

    refs = _ref_forward(model, x)
    assert len(outs) == 6
    for o, r in zip(outs, refs):
        assert o.shape == (2, 3, 4, 8, 8), o.shape
        assert jnp.allclose(o, r, atol=1e-4, rtol=1e-4)

    print("KERNEL_OK")
</pallas_src>

<mosaic_0001>
module attributes {stable_mosaic.version = 11 : i64} {
  func.func @_folded_ensemble_kernel(%arg0: i32, %arg1: i32, %arg2: memref<1x4x256xf32, #tpu.memory_space<vmem>>, %arg3: memref<6x3x4xf32, #tpu.memory_space<vmem>>, %arg4: memref<6x3x1xf32, #tpu.memory_space<vmem>>, %arg5: memref<1x3x256xf32, #tpu.memory_space<vmem>>, %arg6: memref<1x3x256xf32, #tpu.memory_space<vmem>>, %arg7: memref<1x3x256xf32, #tpu.memory_space<vmem>>, %arg8: memref<1x3x256xf32, #tpu.memory_space<vmem>>, %arg9: memref<1x3x256xf32, #tpu.memory_space<vmem>>, %arg10: memref<1x3x256xf32, #tpu.memory_space<vmem>>) attributes {dimension_semantics = [#tpu.dimension_semantics<parallel>, #tpu.dimension_semantics<parallel>], iteration_bounds = array<i64: 2, 1>, scalar_prefetch = 0 : i64, scratch_operands = 0 : i64, tpu.core_type = #tpu.core_type<tc>, window_params = [{transform_indices = @transform_0, window_bounds = array<i64: 1, 4, 256>}, {pipeline_mode = #tpu.pipeline_mode<synchronous>, transform_indices = @transform_1, window_bounds = array<i64: 6, 3, 4>}, {pipeline_mode = #tpu.pipeline_mode<synchronous>, transform_indices = @transform_2, window_bounds = array<i64: 6, 3, 1>}, {transform_indices = @transform_3, window_bounds = array<i64: 1, 3, 256>}, {transform_indices = @transform_4, window_bounds = array<i64: 1, 3, 256>}, {transform_indices = @transform_5, window_bounds = array<i64: 1, 3, 256>}, {transform_indices = @transform_6, window_bounds = array<i64: 1, 3, 256>}, {transform_indices = @transform_7, window_bounds = array<i64: 1, 3, 256>}, {transform_indices = @transform_8, window_bounds = array<i64: 1, 3, 256>}]} {
    %c0 = arith.constant 0 : index
    %c0_0 = arith.constant 0 : index
    %c0_1 = arith.constant 0 : index
    %0 = vector.load %arg2[%c0, %c0_0, %c0_1] : memref<1x4x256xf32, #tpu.memory_space<vmem>>, vector<1x4x256xf32>
    %1 = vector.shape_cast %0 : vector<1x4x256xf32> to vector<4x256xf32>
    %c0_2 = arith.constant 0 : index
    %c0_3 = arith.constant 0 : index
    %c0_4 = arith.constant 0 : index
    %2 = vector.load %arg3[%c0_2, %c0_3, %c0_4] : memref<6x3x4xf32, #tpu.memory_space<vmem>>, vector<1x3x4xf32>
    %3 = vector.shape_cast %2 : vector<1x3x4xf32> to vector<3x4xf32>
    %cst = arith.constant dense<0.000000e+00> : vector<3x256xf32>
    %4 = tpu.matmul %3, %1, %cst {dimension_numbers = #tpu.dot_dimension_numbers<[1], [0], [0], [1], [0, 0, 1, 1], [], []>} : vector<3x4xf32>, vector<4x256xf32>, vector<3x256xf32> -> vector<3x256xf32>
    %c0_5 = arith.constant 0 : index
    %c0_6 = arith.constant 0 : index
    %c0_7 = arith.constant 0 : index
    %5 = vector.load %arg4[%c0_5, %c0_6, %c0_7] : memref<6x3x1xf32, #tpu.memory_space<vmem>>, vector<1x3x1xf32>
    %6 = vector.shape_cast %5 : vector<1x3x1xf32> to vector<3x1xf32>
    %7 = vector.broadcast %6 : vector<3x1xf32> to vector<3x256xf32>
    %8 = arith.addf %4, %7 : vector<3x256xf32>
    %c0_8 = arith.constant 0 : index
    %c0_9 = arith.constant 0 : index
    %c0_10 = arith.constant 0 : index
    %9 = vector.load %arg5[%c0_8, %c0_9, %c0_10] : memref<1x3x256xf32, #tpu.memory_space<vmem>>, vector<1x3x256xf32>
    %10 = vector.shape_cast %9 : vector<1x3x256xf32> to vector<3x256xf32>
    %11 = vector.shape_cast %8 : vector<3x256xf32> to vector<1x3x256xf32>
    tpu.vector_store %arg5[%c0_8, %c0_9, %c0_10], %11 {strides = array<i32>} : memref<1x3x256xf32, #tpu.memory_space<vmem>>, vector<1x3x256xf32>,
    %c1 = arith.constant 1 : index
    %c0_11 = arith.constant 0 : index
    %c0_12 = arith.constant 0 : index
    %12 = vector.load %arg3[%c1, %c0_11, %c0_12] : memref<6x3x4xf32, #tpu.memory_space<vmem>>, vector<1x3x4xf32>
    %13 = vector.shape_cast %12 : vector<1x3x4xf32> to vector<3x4xf32>
    %cst_13 = arith.constant dense<0.000000e+00> : vector<3x256xf32>
    %14 = tpu.matmul %13, %1, %cst_13 {dimension_numbers = #tpu.dot_dimension_numbers<[1], [0], [0], [1], [0, 0, 1, 1], [], []>} : vector<3x4xf32>, vector<4x256xf32>, vector<3x256xf32> -> vector<3x256xf32>
    %c1_14 = arith.constant 1 : index
    %c0_15 = arith.constant 0 : index
    %c0_16 = arith.constant 0 : index
    %15 = vector.load %arg4[%c1_14, %c0_15, %c0_16] : memref<6x3x1xf32, #tpu.memory_space<vmem>>, vector<1x3x1xf32>
    %16 = vector.shape_cast %15 : vector<1x3x1xf32> to vector<3x1xf32>
    %17 = vector.broadcast %16 : vector<3x1xf32> to vector<3x256xf32>
    %18 = arith.addf %14, %17 : vector<3x256xf32>
    %c0_17 = arith.constant 0 : index
    %c0_18 = arith.constant 0 : index
    %c0_19 = arith.constant 0 : index
    %19 = vector.load %arg6[%c0_17, %c0_18, %c0_19] : memref<1x3x256xf32, #tpu.memory_space<vmem>>, vector<1x3x256xf32>
    %20 = vector.shape_cast %19 : vector<1x3x256xf32> to vector<3x256xf32>
    %21 = vector.shape_cast %18 : vector<3x256xf32> to vector<1x3x256xf32>
    tpu.vector_store %arg6[%c0_17, %c0_18, %c0_19], %21 {strides = array<i32>} : memref<1x3x256xf32, #tpu.memory_space<vmem>>, vector<1x3x256xf32>,
    %c2 = arith.constant 2 : index
    %c0_20 = arith.constant 0 : index
    %c0_21 = arith.constant 0 : index
    %22 = vector.load %arg3[%c2, %c0_20, %c0_21] : memref<6x3x4xf32, #tpu.memory_space<vmem>>, vector<1x3x4xf32>
    %23 = vector.shape_cast %22 : vector<1x3x4xf32> to vector<3x4xf32>
    %cst_22 = arith.constant dense<0.000000e+00> : vector<3x256xf32>
    %24 = tpu.matmul %23, %1, %cst_22 {dimension_numbers = #tpu.dot_dimension_numbers<[1], [0], [0], [1], [0, 0, 1, 1], [], []>} : vector<3x4xf32>, vector<4x256xf32>, vector<3x256xf32> -> vector<3x256xf32>
    %c2_23 = arith.constant 2 : index
    %c0_24 = arith.constant 0 : index
    %c0_25 = arith.constant 0 : index
    %25 = vector.load %arg4[%c2_23, %c0_24, %c0_25] : memref<6x3x1xf32, #tpu.memory_space<vmem>>, vector<1x3x1xf32>
    %26 = vector.shape_cast %25 : vector<1x3x1xf32> to vector<3x1xf32>
    %27 = vector.broadcast %26 : vector<3x1xf32> to vector<3x256xf32>
    %28 = arith.addf %24, %27 : vector<3x256xf32>
    %c0_26 = arith.constant 0 : index
    %c0_27 = arith.constant 0 : index
    %c0_28 = arith.constant 0 : index
    %29 = vector.load %arg7[%c0_26, %c0_27, %c0_28] : memref<1x3x256xf32, #tpu.memory_space<vmem>>, vector<1x3x256xf32>
    %30 = vector.shape_cast %29 : vector<1x3x256xf32> to vector<3x256xf32>
    %31 = vector.shape_cast %28 : vector<3x256xf32> to vector<1x3x256xf32>
    tpu.vector_store %arg7[%c0_26, %c0_27, %c0_28], %31 {strides = array<i32>} : memref<1x3x256xf32, #tpu.memory_space<vmem>>, vector<1x3x256xf32>,
    %c3 = arith.constant 3 : index
    %c0_29 = arith.constant 0 : index
    %c0_30 = arith.constant 0 : index
    %32 = vector.load %arg3[%c3, %c0_29, %c0_30] : memref<6x3x4xf32, #tpu.memory_space<vmem>>, vector<1x3x4xf32>
    %33 = vector.shape_cast %32 : vector<1x3x4xf32> to vector<3x4xf32>
    %cst_31 = arith.constant dense<0.000000e+00> : vector<3x256xf32>
    %34 = tpu.matmul %33, %1, %cst_31 {dimension_numbers = #tpu.dot_dimension_numbers<[1], [0], [0], [1], [0, 0, 1, 1], [], []>} : vector<3x4xf32>, vector<4x256xf32>, vector<3x256xf32> -> vector<3x256xf32>
    %c3_32 = arith.constant 3 : index
    %c0_33 = arith.constant 0 : index
    %c0_34 = arith.constant 0 : index
    %35 = vector.load %arg4[%c3_32, %c0_33, %c0_34] : memref<6x3x1xf32, #tpu.memory_space<vmem>>, vector<1x3x1xf32>
    %36 = vector.shape_cast %35 : vector<1x3x1xf32> to vector<3x1xf32>
    %37 = vector.broadcast %36 : vector<3x1xf32> to vector<3x256xf32>
    %38 = arith.addf %34, %37 : vector<3x256xf32>
    %c0_35 = arith.constant 0 : index
    %c0_36 = arith.constant 0 : index
    %c0_37 = arith.constant 0 : index
    %39 = vector.load %arg8[%c0_35, %c0_36, %c0_37] : memref<1x3x256xf32, #tpu.memory_space<vmem>>, vector<1x3x256xf32>
    %40 = vector.shape_cast %39 : vector<1x3x256xf32> to vector<3x256xf32>
    %41 = vector.shape_cast %38 : vector<3x256xf32> to vector<1x3x256xf32>
    tpu.vector_store %arg8[%c0_35, %c0_36, %c0_37], %41 {strides = array<i32>} : memref<1x3x256xf32, #tpu.memory_space<vmem>>, vector<1x3x256xf32>,
    %c4 = arith.constant 4 : index
    %c0_38 = arith.constant 0 : index
    %c0_39 = arith.constant 0 : index
    %42 = vector.load %arg3[%c4, %c0_38, %c0_39] : memref<6x3x4xf32, #tpu.memory_space<vmem>>, vector<1x3x4xf32>
    %43 = vector.shape_cast %42 : vector<1x3x4xf32> to vector<3x4xf32>
    %cst_40 = arith.constant dense<0.000000e+00> : vector<3x256xf32>
    %44 = tpu.matmul %43, %1, %cst_40 {dimension_numbers = #tpu.dot_dimension_numbers<[1], [0], [0], [1], [0, 0, 1, 1], [], []>} : vector<3x4xf32>, vector<4x256xf32>, vector<3x256xf32> -> vector<3x256xf32>
    %c4_41 = arith.constant 4 : index
    %c0_42 = arith.constant 0 : index
    %c0_43 = arith.constant 0 : index
    %45 = vector.load %arg4[%c4_41, %c0_42, %c0_43] : memref<6x3x1xf32, #tpu.memory_space<vmem>>, vector<1x3x1xf32>
    %46 = vector.shape_cast %45 : vector<1x3x1xf32> to vector<3x1xf32>
    %47 = vector.broadcast %46 : vector<3x1xf32> to vector<3x256xf32>
    %48 = arith.addf %44, %47 : vector<3x256xf32>
    %c0_44 = arith.constant 0 : index
    %c0_45 = arith.constant 0 : index
    %c0_46 = arith.constant 0 : index
    %49 = vector.load %arg9[%c0_44, %c0_45, %c0_46] : memref<1x3x256xf32, #tpu.memory_space<vmem>>, vector<1x3x256xf32>
    %50 = vector.shape_cast %49 : vector<1x3x256xf32> to vector<3x256xf32>
    %51 = vector.shape_cast %48 : vector<3x256xf32> to vector<1x3x256xf32>
    tpu.vector_store %arg9[%c0_44, %c0_45, %c0_46], %51 {strides = array<i32>} : memref<1x3x256xf32, #tpu.memory_space<vmem>>, vector<1x3x256xf32>,
    %c5 = arith.constant 5 : index
    %c0_47 = arith.constant 0 : index
    %c0_48 = arith.constant 0 : index
    %52 = vector.load %arg3[%c5, %c0_47, %c0_48] : memref<6x3x4xf32, #tpu.memory_space<vmem>>, vector<1x3x4xf32>
    %53 = vector.shape_cast %52 : vector<1x3x4xf32> to vector<3x4xf32>
    %cst_49 = arith.constant dense<0.000000e+00> : vector<3x256xf32>
    %54 = tpu.matmul %53, %1, %cst_49 {dimension_numbers = #tpu.dot_dimension_numbers<[1], [0], [0], [1], [0, 0, 1, 1], [], []>} : vector<3x4xf32>, vector<4x256xf32>, vector<3x256xf32> -> vector<3x256xf32>
    %c5_50 = arith.constant 5 : index
    %c0_51 = arith.constant 0 : index
    %c0_52 = arith.constant 0 : index
    %55 = vector.load %arg4[%c5_50, %c0_51, %c0_52] : memref<6x3x1xf32, #tpu.memory_space<vmem>>, vector<1x3x1xf32>
    %56 = vector.shape_cast %55 : vector<1x3x1xf32> to vector<3x1xf32>
    %57 = vector.broadcast %56 : vector<3x1xf32> to vector<3x256xf32>
    %58 = arith.addf %54, %57 : vector<3x256xf32>
    %c0_53 = arith.constant 0 : index
    %c0_54 = arith.constant 0 : index
    %c0_55 = arith.constant 0 : index
    %59 = vector.load %arg10[%c0_53, %c0_54, %c0_55] : memref<1x3x256xf32, #tpu.memory_space<vmem>>, vector<1x3x256xf32>
    %60 = vector.shape_cast %59 : vector<1x3x256xf32> to vector<3x256xf32>
    %61 = vector.shape_cast %58 : vector<3x256xf32> to vector<1x3x256xf32>
    tpu.vector_store %arg10[%c0_53, %c0_54, %c0_55], %61 {strides = array<i32>} : memref<1x3x256xf32, #tpu.memory_space<vmem>>, vector<1x3x256xf32>,
    return
  }
  func.func @transform_0(%arg0: i32, %arg1: i32) -> (i32, i32, i32) {
    %c0_i32 = arith.constant 0 : i32
    %c0_i32_0 = arith.constant 0 : i32
    return %arg0, %c0_i32, %arg1 : i32, i32, i32
  }
  func.func @transform_1(%arg0: i32, %arg1: i32) -> (i32, i32, i32) {
    %c0_i32 = arith.constant 0 : i32
    %c0_i32_0 = arith.constant 0 : i32
    %c0_i32_1 = arith.constant 0 : i32
    %c0_i32_2 = arith.constant 0 : i32
    return %c0_i32, %c0_i32_0, %c0_i32_1 : i32, i32, i32
  }
  func.func @transform_2(%arg0: i32, %arg1: i32) -> (i32, i32, i32) {
    %c0_i32 = arith.constant 0 : i32
    %c0_i32_0 = arith.constant 0 : i32
    %c0_i32_1 = arith.constant 0 : i32
    %c0_i32_2 = arith.constant 0 : i32
    return %c0_i32, %c0_i32_0, %c0_i32_1 : i32, i32, i32
  }
  func.func @transform_3(%arg0: i32, %arg1: i32) -> (i32, i32, i32) {
    %c0_i32 = arith.constant 0 : i32
    %c0_i32_0 = arith.constant 0 : i32
    return %arg0, %c0_i32, %arg1 : i32, i32, i32
  }
  func.func @transform_4(%arg0: i32, %arg1: i32) -> (i32, i32, i32) {
    %c0_i32 = arith.constant 0 : i32
    %c0_i32_0 = arith.constant 0 : i32
    return %arg0, %c0_i32, %arg1 : i32, i32, i32
  }
  func.func @transform_5(%arg0: i32, %arg1: i32) -> (i32, i32, i32) {
    %c0_i32 = arith.constant 0 : i32
    %c0_i32_0 = arith.constant 0 : i32
    return %arg0, %c0_i32, %arg1 : i32, i32, i32
  }
  func.func @transform_6(%arg0: i32, %arg1: i32) -> (i32, i32, i32) {
    %c0_i32 = arith.constant 0 : i32
    %c0_i32_0 = arith.constant 0 : i32
    return %arg0, %c0_i32, %arg1 : i32, i32, i32
  }
  func.func @transform_7(%arg0: i32, %arg1: i32) -> (i32, i32, i32) {
    %c0_i32 = arith.constant 0 : i32
    %c0_i32_0 = arith.constant 0 : i32
    return %arg0, %c0_i32, %arg1 : i32, i32, i32
  }
  func.func @transform_8(%arg0: i32, %arg1: i32) -> (i32, i32, i32) {
    %c0_i32 = arith.constant 0 : i32
    %c0_i32_0 = arith.constant 0 : i32
    return %arg0, %c0_i32, %arg1 : i32, i32, i32
  }
}

</mosaic_0001>

<bundles_post_ra>
// kernel: tpu_custom_call.1
= control target key start
LH: loop header
LB: loop body
LE: loop exit
PB: predicated region body
PF: predicated region fallthrough
CT: control target
= control target key end

     0   :  { %s1350_s27 = smov 0   ;;  %s1352_s28 = smov 0   ;;  %s1473_s0 = inlined_call_operand.vmem [shape: f32[2,4,256], index: 0, kind: input, shape index: {}]   ;;  %s1474_s1 = inlined_call_operand.vmem [shape: f32[6,3,4], index: 1, kind: input, shape index: {}]   ;;  %s1475_s2 = inlined_call_operand.vmem [shape: f32[6,3,1], index: 2, kind: input, shape index: {}]   ;;  %s1476_s3 = inlined_call_operand.vmem [shape: f32[2,3,256], index: 3, kind: output, shape index: {0}]   ;;  %s1477_s4 = inlined_call_operand.vmem [shape: f32[2,3,256], index: 4, kind: output, shape index: {1}]   ;;  %s1478_s5 = inlined_call_operand.vmem [shape: f32[2,3,256], index: 5, kind: output, shape index: {2}]   ;;  %s1479_s6 = inlined_call_operand.vmem [shape: f32[2,3,256], index: 6, kind: output, shape index: {3}]   ;;  %s1480_s7 = inlined_call_operand.vmem [shape: f32[2,3,256], index: 7, kind: output, shape index: {4}]   ;;  %s1481_s8 = inlined_call_operand.vmem [shape: f32[2,3,256], index: 8, kind: output, shape index: {5}]  }
   0x1   :  { %s1354_s29 = smov 0  }
   0x2 LB: > { %s31_s30 = sadd.s32 1, %s1298_s28  ;;  %p1194_p0 = scmp.ge.s32.totalorder %s1302_s29, 1  ;;  %s1302_s29 = sphi %s1354_s29, %s19_s29   ;;  %s1298_s28 = sphi %s1352_s28, %s1483_s28   ;;  %s1294_s27 = sphi %s1350_s27, %s1482_s27  }
   0x3   : > { %p33_p1 = scmp.ge.s32.totalorder %s31_s30, 2  ;;  %p304_p2 = scmp.lt.s32.totalorder %s1302_s29, 3 }
   0x5   : > { %s1485_s30 = smov (%p33_p1, %s31_s30), 0  ;;  %p305_p3 = pnand %p1194_p0, %p304_p2 }
   0x6   : > { %p392_p4 = scmp.lt.s32.totalorder (!%p305_p3), %s1294_s27, 1 }
   0x7   : > { %308 = sbr.rel (%p305_p3) target bundleno = 203 (0xcb), region = 32 }
   0xc   : > { %s1487_s27 = smov (!%p392_p4, %s1294_s27), 1  ;;  %vm477_vm0 = vcmask 1043456   ;;  %vm473_vm1 = vcmask 31744   ;;  %v462_v1 = vld [vmem:[%s1474_s1] sm:$0x7]  ;;  %v1304_v5 = vmov 0  }
   0xd   : > { %s1368_s9 = sshll.u32 %s1487_s27, 3  ;;  %v463_v4 = vld [vmem:[%s1475_s2] sm:$0x7]  ;;  %1277 = vset.pattern.permute.xlu0 %v1304_v5  ;;  %1278 = vset.pattern.permute.xlu1 %v1304_v5  ;;  %v1213_v6 = vld [vmem:[%s1474_s1 + $0x4] sm:$0x7] }
   0xe   : > { %s399_s12 = scalar_lea.vmem %s1473_s0, %s1368_s9  ;;  %466 = vperm.xlu0 %1277, %v463_v4   ;;  %1279 = vset.pattern.permute.xlu2 %v1304_v5  ;;  %v1220_v9 = vld [vmem:[%s1475_s2 + $0x8] sm:$0x7]  ;;  %v1214_v10 = vld [vmem:[%s1475_s2 + $0x4] sm:$0x7]  ;;  %v1232_v11 = vld [vmem:[%s1475_s2 + $0x10] sm:$0x7]  ;;  %s409_s21 = scalar_lea.vmem %s1476_s3, %s1368_s9 }
   0xf   : > { %v461_v0 = vld [vmem:[%s399_s12] sm:$0xff]  ;;  %599 = vperm.xlu1 %1278, %v1220_v9   ;;  %729 = vperm.xlu2 %1279, %v1232_v11   ;;  %v1219_v12 = vld [vmem:[%s1474_s1 + $0x8] sm:$0x7]  ;;  %v1226_v13 = vld [vmem:[%s1475_s2 + $0xc] sm:$0x7]  ;;  %s419_s24 = scalar_lea.vmem %s1477_s4, %s1368_s9  ;;  %s429_s27 = scalar_lea.vmem %s1478_s5, %s1368_s9 }
  0x10   : > { %470 = vst [vmem:[#allocation1] ss:$2 sm:$0xff] %v461_v0  ;;  %v1238_v14 = vld [vmem:[%s1475_s2 + $0x14] sm:$0x7]  ;;  %v1225_v17 = vld [vmem:[%s1474_s1 + $0xc] sm:$0x7]  ;;  %s439_s12 = scalar_lea.vmem %s1479_s6, %s1368_s9  ;;  %s449_s15 = scalar_lea.vmem %s1480_s7, %s1368_s9 }
  0x11   : > { %v1231_v20 = vld [vmem:[%s1474_s1 + $0x10] sm:$0x7]  ;;  %v1237_v23 = vld [vmem:[%s1474_s1 + $0x14] sm:$0x7]  ;;  %s459_s18 = scalar_lea.vmem %s1481_s8, %s1368_s9 }
  0x16   : > { %534 = vperm.xlu0 %1277, %v1214_v10  }
  0x17   : > { %v471_v2 = vld.sshfl [vmem:[#allocation1] sm:$0xff pattern:$0x75316420]  ;;  %v472_v3 = vld.sshfl [vmem:[#allocation1 + $0x8] sm:$0xff pattern:$0x75316420]  ;;  %664 = vperm.xlu1 %1278, %v1226_v13   ;;  %794 = vperm.xlu2 %1279, %v1238_v14  }
  0x18   : > { %537 = vst [vmem:[#allocation1] ss:$2 sm:$0xff] %v461_v0  ;;  %1211 = vmatpush.msk.msra.mxu1 %vm477_vm0, %v472_v3  ;;  %1209 = vmatpush.msk.msra.mxu0 %vm477_vm0, %v471_v2 }
  0x19   : > { %1212 = vmatmul.msk.f32.vlgmr.msra.gmra.mxu1 %vm473_vm1, %v462_v1  ;;  %1210 = vmatmul.msk.f32.vlgmr.msra.gmra.mxu0 %vm473_vm1, %v462_v1 }
  0x1f   : > { %v538_v7 = vld.sshfl [vmem:[#allocation1] sm:$0xff pattern:$0x75316420]  ;;  %v539_v8 = vld.sshfl [vmem:[#allocation1 + $0x8] sm:$0xff pattern:$0x75316420] }
  0x20   : > { %1215 = vmatpush.msk.msra.mxu2 %vm477_vm0, %v538_v7  ;;  %1217 = vmatpush.msk.msra.mxu3 %vm477_vm0, %v539_v8  ;;  %602 = vst [vmem:[#allocation1] ss:$2 sm:$0xff] %v461_v0 }
  0x21   : > { %1216 = vmatmul.msk.f32.vlgmr.msra.gmra.mxu2 %vm473_vm1, %v1213_v6  ;;  %1218 = vmatmul.msk.f32.vlgmr.msra.gmra.mxu3 %vm473_vm1, %v1213_v6 }
  0x27   : > { %v603_v15 = vld.sshfl [vmem:[#allocation1] sm:$0xff pattern:$0x75316420]  ;;  %v604_v16 = vld.sshfl [vmem:[#allocation1 + $0x8] sm:$0xff pattern:$0x75316420] }
  0x28   : > { %667 = vst [vmem:[#allocation1] ss:$2 sm:$0xff] %v461_v0  ;;  %1223 = vmatpush.msk.msrb.mxu1 %vm477_vm0, %v604_v16  ;;  %1221 = vmatpush.msk.msrb.mxu0 %vm477_vm0, %v603_v15 }
  0x29   : > { %1224 = vmatmul.msk.f32.vlgmr.msrb.gmra.mxu1 %vm473_vm1, %v1219_v12  ;;  %1222 = vmatmul.msk.f32.vlgmr.msrb.gmra.mxu0 %vm473_vm1, %v1219_v12 }
  0x2f   : > { %v668_v18 = vld.sshfl [vmem:[#allocation1] sm:$0xff pattern:$0x75316420]  ;;  %v669_v19 = vld.sshfl [vmem:[#allocation1 + $0x8] sm:$0xff pattern:$0x75316420] }
  0x30   : > { %1227 = vmatpush.msk.msrb.mxu2 %vm477_vm0, %v668_v18  ;;  %1229 = vmatpush.msk.msrb.mxu3 %vm477_vm0, %v669_v19  ;;  %732 = vst [vmem:[#allocation1] ss:$2 sm:$0xff] %v461_v0 }
  0x31   : > { %1228 = vmatmul.msk.f32.vlgmr.msrb.gmra.mxu2 %vm473_vm1, %v1225_v17  ;;  %1230 = vmatmul.msk.f32.vlgmr.msrb.gmra.mxu3 %vm473_vm1, %v1225_v17 }
  0x37   : > { %v733_v21 = vld.sshfl [vmem:[#allocation1] sm:$0xff pattern:$0x75316420]  ;;  %v734_v22 = vld.sshfl [vmem:[#allocation1 + $0x8] sm:$0xff pattern:$0x75316420] }
  0x38   : > { %797 = vst [vmem:[#allocation1] ss:$2 sm:$0xff] %v461_v0  ;;  %1235 = vmatpush.msk.msra.mxu1 %vm477_vm0, %v734_v22  ;;  %1233 = vmatpush.msk.msra.mxu0 %vm477_vm0, %v733_v21 }
  0x39   : > { %1236 = vmatmul.msk.f32.vlgmr.msra.gmra.mxu1 %vm473_vm1, %v1231_v20  ;;  %1234 = vmatmul.msk.f32.vlgmr.msra.gmra.mxu0 %vm473_vm1, %v1231_v20 }
  0x3f   : > { %v798_v24 = vld.sshfl [vmem:[#allocation1] sm:$0xff pattern:$0x75316420]  ;;  %v799_v25 = vld.sshfl [vmem:[#allocation1 + $0x8] sm:$0xff pattern:$0x75316420] }
  0x40   : > { %1239 = vmatpush.msk.msra.mxu2 %vm477_vm0, %v798_v24  ;;  %1241 = vmatpush.msk.msra.mxu3 %vm477_vm0, %v799_v25 }
  0x41   : > { %1240 = vmatmul.msk.f32.vlgmr.msra.gmra.mxu2 %vm473_vm1, %v1237_v23  ;;  %1242 = vmatmul.msk.f32.vlgmr.msra.gmra.mxu3 %vm473_vm1, %v1237_v23 }
  0x69   : > { %v730_v50 = vpop.permute.xlu2 %729 }
  0x71   : > { %v795_v61 = vpop.permute.xlu2 %794 }
  0x80   : > { %v467_v26 = vpop.permute.xlu0 %466 }
  0x81   : > { %v600_v36 = vpop.permute.xlu1 %599 }
  0x88   : > { %v535_v33 = vpop.permute.xlu0 %534 }
  0x89   : > { %v665_v47 = vpop.permute.xlu1 %664 }
  0x96   : > { %v519_v27 = vpop.f32.mrf.mxu1  ;;  %v499_v28 = vpop.f32.mrf.mxu0 }
  0x97   : > { %v520_v29 = vadd.f32 %v519_v27, %v467_v26  ;;  %v500_v30 = vadd.f32 %v499_v28, %v467_v26 }
  0x99   : > { %v524_v31 = vrot.slane %v520_v29, 4 }
  0x9b   : > { %v525_v32 = vsel %vm477_vm0, %v500_v30, %v524_v31 }
  0x9c   : > { %527 = vst [vmem:[%s409_s21] sm:$0x77] %v525_v32 }
  0xa4   : > { %v564_v34 = vpop.f32.mrf.mxu2  ;;  %v584_v35 = vpop.f32.mrf.mxu3 }
  0xa5   : > { %v565_v37 = vadd.f32 %v564_v34, %v535_v33  ;;  %v585_v38 = vadd.f32 %v584_v35, %v535_v33 }
  0xa6   : > { %v649_v39 = vpop.f32.mrf.mxu1  ;;  %v629_v40 = vpop.f32.mrf.mxu0 }
  0xa7   : > { %v650_v41 = vadd.f32 %v649_v39, %v600_v36  ;;  %v589_v42 = vrot.slane %v585_v38, 4  ;;  %v630_v43 = vadd.f32 %v629_v40, %v600_v36 }
  0xa9   : > { %v654_v44 = vrot.slane %v650_v41, 4  ;;  %v590_v45 = vsel %vm477_vm0, %v565_v37, %v589_v42 }
  0xaa   : > { %592 = vst [vmem:[%s419_s24] sm:$0x77] %v590_v45 }
  0xab   : > { %v655_v46 = vsel %vm477_vm0, %v630_v43, %v654_v44 }
  0xac   : > { %657 = vst [vmem:[%s429_s27] sm:$0x77] %v655_v46 }
  0xb4   : > { %v694_v48 = vpop.f32.mrf.mxu2  ;;  %v714_v49 = vpop.f32.mrf.mxu3 }
  0xb5   : > { %v695_v51 = vadd.f32 %v694_v48, %v665_v47  ;;  %v715_v52 = vadd.f32 %v714_v49, %v665_v47 }
  0xb6   : > { %v779_v53 = vpop.f32.mrf.mxu1  ;;  %v759_v54 = vpop.f32.mrf.mxu0 }
  0xb7   : > { %v719_v55 = vrot.slane %v715_v52, 4  ;;  %v780_v56 = vadd.f32 %v779_v53, %v730_v50  ;;  %v760_v57 = vadd.f32 %v759_v54, %v730_v50 }
  0xb9   : > { %v720_v58 = vsel %vm477_vm0, %v695_v51, %v719_v55  ;;  %v784_v59 = vrot.slane %v780_v56, 4 }
  0xba   : > { %722 = vst [vmem:[%s439_s12] sm:$0x77] %v720_v58 }
  0xbb   : > { %v785_v60 = vsel %vm477_vm0, %v760_v57, %v784_v59 }
  0xbc   : > { %787 = vst [vmem:[%s449_s15] sm:$0x77] %v785_v60 }
  0xc4   : > { %v824_v62 = vpop.f32.mrf.mxu2  ;;  %v844_v63 = vpop.f32.mrf.mxu3 }
  0xc5   : > { %v845_v0 = vadd.f32 %v844_v63, %v795_v61  ;;  %v825_v1 = vadd.f32 %v824_v62, %v795_v61 }
  0xc7   : > { %v849_v2 = vrot.slane %v845_v0, 4 }
  0xc9   : > { %v850_v3 = vsel %vm477_vm0, %v825_v1, %v849_v2 }
  0xca   : > { %852 = vst [vmem:[%s459_s18] sm:$0x77] %v850_v3 }
  0xcb PF: > { %s19_s29 = sadd.s32 1, %s1302_s29   ;;  %s1482_s27 = smov %s1298_s28 }
  0xcc   : > { %p16_p5 = scmp.ge.s32.totalorder %s19_s29, 4   ;;  %s1483_s28 = smov %s1485_s30 }
  0xce   :  { %18 = sbr.rel (!%p16_p5) target bundleno = 2 (0x2), region = 132 }

</bundles_post_ra>
